<compile_context>
chip_gen: v7x
topology: tpu7x:2x2x1
jax: 0.10.0
libtpu: 0.0.40
codegen_flags: <defaults>
</compile_context>

<pallas_src>
import jax
import jax.numpy as jnp
from jax.experimental import pallas as pl
from jax.experimental.pallas import tpu as pltpu


def _hash_layer_kernel(x_ref, w_ref, b_ref, o_ref):
    # x_ref: [TM, last_node]       f32 or bf16 activations
    # w_ref: [last_node, code_pad] bf16 (pre-transposed, lane-padded)
    # b_ref: [1, code_pad]         f32
    # o_ref: [TM, code_pad]        bf16 (default) or f32
    feat = jnp.maximum(x_ref[...], 0)                    # ReLU in input dtype
    feat_bf16 = feat.astype(jnp.bfloat16)                # MXU-native operand (no-op if already bf16)
    logits = jnp.dot(feat_bf16, w_ref[...],
                     preferred_element_type=jnp.float32)  # f32 accumulation on MXU
    o_ref[...] = jnp.tanh(logits + b_ref[...]).astype(o_ref.dtype)


def hash_layer_forward(x, w_t, b, *, tm=1024, out_dtype=jnp.bfloat16):
    """y = tanh(relu(x) @ w_t + b), fused in one Pallas kernel.

    x   : [B, last_node]        f32 or bf16
    w_t : [last_node, code_pad] bf16 (pre-transposed Linear weight, lane-padded)
    b   : [1, code_pad]         f32
    returns [B, code_pad] out_dtype (caller slices valid code_length columns
    if code_pad != code_length).
    """
    B, last_node = x.shape
    ln_w, code_pad = w_t.shape
    assert ln_w == last_node

    if B <= tm:
        # Small batch: single block resident in VMEM, no grid / pipeline machinery.
        return pl.pallas_call(
            _hash_layer_kernel,
            out_shape=jax.ShapeDtypeStruct((B, code_pad), out_dtype),
            in_specs=[
                pl.BlockSpec(memory_space=pltpu.MemorySpace.VMEM),
                pl.BlockSpec(memory_space=pltpu.MemorySpace.VMEM),
                pl.BlockSpec(memory_space=pltpu.MemorySpace.VMEM),
            ],
            out_specs=pl.BlockSpec(memory_space=pltpu.MemorySpace.VMEM),
        )(x, w_t, b)

    # Large batch: tile the batch axis (>= 2 tiles since B > tm, so the
    # "parallel" axis can be sharded across v7x's 2 TensorCores).  Weight and
    # bias index_maps are constant -> they stay resident in VMEM across steps.
    # No pad/slice: Pallas handles the ragged last tile (padded reads, masked
    # writes).
    n_tiles = pl.cdiv(B, tm)
    return pl.pallas_call(
        _hash_layer_kernel,
        out_shape=jax.ShapeDtypeStruct((B, code_pad), out_dtype),
        grid=(n_tiles,),
        in_specs=[
            pl.BlockSpec((tm, last_node), lambda i: (i, 0)),
            pl.BlockSpec((last_node, code_pad), lambda i: (0, 0)),
            pl.BlockSpec((1, code_pad), lambda i: (0, 0)),
        ],
        out_specs=pl.BlockSpec((tm, code_pad), lambda i: (i, 0)),
        compiler_params=pltpu.CompilerParams(
            dimension_semantics=("parallel",)),   # v7x: shard batch over 2 TCs
    )(x, w_t, b)


class ModelWrapperPallas:
    """JAX/Pallas port of ModelWrapper (hash_layer path).

    Note: bf16 weight/activation operands are not bit-identical to the f32
    PyTorch nn.Linear, but are more than sufficient for tanh/sign hash codes.
    """

    def __init__(self, last_node, code_length, num_cluster, key,
                 tm=1024, out_dtype=jnp.bfloat16):
        k1, k2, k3, k4 = jax.random.split(key, 4)
        self.code_length = code_length
        self.tm = tm
        self.out_dtype = out_dtype
        # Lane-pad the hash-code dim to a multiple of 128 for lane-dense stores.
        self.code_pad = ((code_length + 127) // 128) * 128

        # nn.Linear(last_node, code_length): weight [code_length, last_node], bias [code_length]
        bound = 1.0 / (last_node ** 0.5)
        w = jax.random.uniform(k1, (code_length, last_node),
                               minval=-bound, maxval=bound, dtype=jnp.float32)
        b = jax.random.uniform(k2, (code_length,),
                               minval=-bound, maxval=bound, dtype=jnp.float32)
        w_t = jnp.pad(w.T, ((0, 0), (0, self.code_pad - code_length)))
        b_p = jnp.pad(b, (0, self.code_pad - code_length)).reshape(1, self.code_pad)
        self.w_t = w_t.astype(jnp.bfloat16)         # bf16 weight: MXU-native, half DMA
        self.b = b_p                                # f32 bias (added post-accumulation)

        # head params (unused in forward, kept for shape parity with __init__)
        self.head_w = jax.random.uniform(k3, (num_cluster, last_node),
                                         minval=-bound, maxval=bound, dtype=jnp.float32)
        self.head_b = jax.random.uniform(k4, (num_cluster,),
                                         minval=-bound, maxval=bound, dtype=jnp.float32)
        self.extract_features = False

    def set_extract_features(self, flag):
        self.extract_features = flag

    def __call__(self, x):
        feature = x  # backbone treated as identity (see TODO above)
        if self.extract_features:
            return feature
        y = hash_layer_forward(feature, self.w_t, self.b,
                               tm=self.tm, out_dtype=self.out_dtype)
        if self.code_pad != self.code_length:
            y = y[:, :self.code_length]
        return y


if __name__ == "__main__":
    key = jax.random.PRNGKey(0)
    B, last_node, code_length, num_cluster = 8, 256, 128, 16

    kx, kp, kx2 = jax.random.split(key, 3)
    x = jax.random.normal(kx, (B, last_node), dtype=jnp.float32)

    model = ModelWrapperPallas(last_node, code_length, num_cluster, kp)

    def ref_fn(inp):
        feat = jnp.maximum(inp, 0.0).astype(jnp.bfloat16)
        logits = jnp.dot(feat, model.w_t,
                         preferred_element_type=jnp.float32) + model.b
        return jnp.tanh(logits)[:, :code_length].astype(jnp.float32)

    # Small-batch (single-block, no-grid) path.
    y = jax.block_until_ready(model(x))
    assert y.shape == (B, code_length)
    assert jnp.allclose(y.astype(jnp.float32), ref_fn(x), atol=2e-2, rtol=2e-2)

    # Batch-tiled ("parallel" grid) path with a ragged last tile
    # (1536 = 1024 + 512 -> exercises the masked-write partial block).
    B2 = 1536
    x2 = jax.random.normal(kx2, (B2, last_node), dtype=jnp.float32)
    y2 = jax.block_until_ready(model(x2))
    assert y2.shape == (B2, code_length)
    assert jnp.allclose(y2.astype(jnp.float32), ref_fn(x2), atol=2e-2, rtol=2e-2)

    print("KERNEL_OK")
</pallas_src>

<mosaic_0001>
module attributes {stable_mosaic.version = 11 : i64} {
  func.func @_hash_layer_kernel(%arg0: memref<8x256xf32, #tpu.memory_space<vmem>>, %arg1: memref<256x128xbf16, #tpu.memory_space<vmem>>, %arg2: memref<1x128xf32, #tpu.memory_space<vmem>>, %arg3: memref<8x128xbf16, #tpu.memory_space<vmem>>) attributes {dimension_semantics = [], scalar_prefetch = 0 : i64, scratch_operands = 0 : i64, tpu.core_type = #tpu.core_type<tc>} {
    %c0 = arith.constant 0 : index
    %c0_0 = arith.constant 0 : index
    %0 = vector.load %arg0[%c0, %c0_0] : memref<8x256xf32, #tpu.memory_space<vmem>>, vector<8x256xf32>
    %cst = arith.constant 0.000000e+00 : f32
    %1 = vector.broadcast %cst : f32 to vector<8x256xf32>
    %2 = arith.maximumf %0, %1 : vector<8x256xf32>
    %3 = arith.truncf %2 : vector<8x256xf32> to vector<8x256xbf16>
    %c0_1 = arith.constant 0 : index
    %c0_2 = arith.constant 0 : index
    %4 = vector.load %arg1[%c0_1, %c0_2] : memref<256x128xbf16, #tpu.memory_space<vmem>>, vector<256x128xbf16>
    %cst_3 = arith.constant dense<0.000000e+00> : vector<8x128xf32>
    %5 = tpu.matmul %3, %4, %cst_3 {dimension_numbers = #tpu.dot_dimension_numbers<[1], [0], [0], [1], [0, 0, 1, 1], [], []>} : vector<8x256xbf16>, vector<256x128xbf16>, vector<8x128xf32> -> vector<8x128xf32>
    %c0_4 = arith.constant 0 : index
    %c0_5 = arith.constant 0 : index
    %6 = vector.load %arg2[%c0_4, %c0_5] : memref<1x128xf32, #tpu.memory_space<vmem>>, vector<1x128xf32>
    %7 = vector.broadcast %6 : vector<1x128xf32> to vector<8x128xf32>
    %8 = arith.addf %5, %7 : vector<8x128xf32>
    %9 = math.tanh %8 : vector<8x128xf32>
    %10 = arith.truncf %9 : vector<8x128xf32> to vector<8x128xbf16>
    %c0_6 = arith.constant 0 : index
    %c0_7 = arith.constant 0 : index
    %11 = vector.load %arg3[%c0_6, %c0_7] : memref<8x128xbf16, #tpu.memory_space<vmem>>, vector<8x128xbf16>
    tpu.vector_store %arg3[%c0_6, %c0_7], %10 {strides = array<i32>} : memref<8x128xbf16, #tpu.memory_space<vmem>>, vector<8x128xbf16>,
    return
  }
}

</mosaic_0001>

<bundles_post_ra>
// kernel: tpu_custom_call.1
= control target key start
LH: loop header
LB: loop body
LE: loop exit
PB: predicated region body
PF: predicated region fallthrough
CT: control target
= control target key end

     0   :  { %8 = vsyncpa [#allocation3], 0  ;;  %s447_s0 = inlined_call_operand.hbm [shape: f32[8,256], index: 0, kind: input, shape index: {}]   ;;  %s448_s1 = inlined_call_operand.hbm [shape: bf16[256,128], index: 1, kind: input, shape index: {}]   ;;  %s449_s2 = inlined_call_operand.vmem [shape: f32[1,128], index: 2, kind: input, shape index: {}]   ;;  %s450_s3 = inlined_call_operand.hbm [shape: bf16[8,128], index: 3, kind: output, shape index: {}]  }
   0x1   :  { %9 = vsyncpa [#allocation6], 0 }
   0x2   :  { %10 = vsyncpa [#allocation4], 0  ;;  %s376_s12 = smov [#allocation2]   ;;  %s377_s14 = smov [#allocation5]  }
   0x3   :  { %s17_s13 = sshll.u32 %s376_s12, 4  ;;  %s26_s15 = sshll.u32 %s377_s14, 4  ;;  %s18_s13 = int_to_ptr.vmem [resolvable:$true] %s17_s13  ;;  %s401_s15 = int_to_ptr.vmem [resolvable:$true] %s26_s15 }
   0x4   :  { %s304_s18 = scalar_lea.hbm %s447_s0, 256 }
   0x5   :  { %p305_p0 = scmp.ne.s32.totalorder %s447_s0, %s304_s18  ;;  %p308_p1 = scmp.lt.u32.totalorder %s304_s18, %s447_s0 }
   0x7   :  { %p310_p2 = pnand %p308_p1, %p305_p0 }
   0x9   :  { %313 = shalt.err (!%p310_p2)
}
   0xa   :  { %s314_s23 = scalar_lea.vmem %s18_s13, 256  ;;  %p319_p4 = scmp.lt.s32.totalorder %s18_s13, %s18_s13 }
   0xb   :  { %p315_p3 = scmp.ne.s32.totalorder %s18_s13, %s314_s23  ;;  %p320_p5 = scmp.lt.s32.totalorder %s314_s23, %s314_s23 }
   0xd   :  { %p321_p6 = por %p320_p5, %p319_p4 }
   0xf   :  { %p322_p7 = pnand %p321_p6, %p315_p3 }
  0x11   :  { %325 = shalt.err (!%p322_p7)
}
  0x12   :  { %20 = dma.hbm_to_vmem [thread:$0]  %s447_s0, 256, %s18_s13, [#allocation3]  }
  0x13   :  { %s326_s28 = scalar_lea.hbm %s448_s1, 2048 }
  0x14   :  { %p327_p8 = scmp.ne.s32.totalorder %s448_s1, %s326_s28  ;;  %p330_p9 = scmp.lt.u32.totalorder %s326_s28, %s448_s1 }
  0x16   :  { %p332_p10 = pnand %p330_p9, %p327_p8 }
  0x18   :  { %335 = shalt.err (!%p332_p10)
}
  0x19   :  { %s336_s6 = scalar_lea.vmem %s401_s15, 2048  ;;  %p341_p12 = scmp.lt.s32.totalorder %s401_s15, %s401_s15 }
  0x1a   :  { %p337_p11 = scmp.ne.s32.totalorder %s401_s15, %s336_s6  ;;  %p342_p13 = scmp.lt.s32.totalorder %s336_s6, %s336_s6 }
  0x1c   :  { %p343_p0 = por %p342_p13, %p341_p12 }
  0x1e   :  { %p344_p1 = pnand %p343_p0, %p337_p11 }
  0x20   :  { %347 = shalt.err (!%p344_p1)
}
  0x21   :  { %s378_s0 = smov 64   ;;  %s379_s7 = smov 4  }
  0x22   :  { %32 = dma.hbm_to_vmem [thread:$0]  %s448_s1, 2048, %s401_s15, [#allocation6], %s378_s0, %s378_s0, %s379_s7  }
  0x23   :  { %370 = dma.done.wait [#allocation3], 256  }
  0x24   :  { %371 = vsyncadd [#allocation3], 4294967040 }
  0x25   :  { %372 = dma.done.wait [#allocation6], 2048  }
  0x26   :  { %373 = vsyncadd [#allocation6], 4294965248  ;;  %v286_v0 = vld [vmem:[#allocation5 + $0x40] sm:$0xff]   ;;  %v288_v2 = vld [vmem:[#allocation5 + $0x48] sm:$0xff]   ;;  %s380_s11 = smov [#allocation7]  }
  0x27   :  { %v287_v1 = vld [vmem:[#allocation5] sm:$0xff]   ;;  %259 = vmatprep.subr.bf16.mxu0 %v286_v0  ;;  %v289_v3 = vld [vmem:[#allocation5 + $0x8] sm:$0xff]   ;;  %v290_v4 = vld [vmem:[#allocation5 + $0x50] sm:$0xff]   ;;  %s232_s12 = sshll.u32 %s380_s11, 4  ;;  %s233_s12 = int_to_ptr.vmem [resolvable:$true] %s232_s12 }
  0x28   :  { %260 = vmatpush3.bf16.msra.mxu0 %v287_v1  ;;  %v291_v5 = vld [vmem:[#allocation5 + $0x10] sm:$0xff]   ;;  %v292_v6 = vld [vmem:[#allocation5 + $0x58] sm:$0xff]   ;;  %v294_v8 = vld [vmem:[#allocation5 + $0x60] sm:$0xff]   ;;  %s348_s13 = scalar_lea.vmem %s233_s12, 64  ;;  %p353_p3 = scmp.lt.s32.totalorder %s233_s12, %s233_s12 }
  0x29   :  { %261 = vmatprep.subr.bf16.mxu0 %v288_v2  ;;  %v293_v7 = vld [vmem:[#allocation5 + $0x18] sm:$0xff]   ;;  %v295_v9 = vld [vmem:[#allocation5 + $0x20] sm:$0xff]   ;;  %v296_v10 = vld [vmem:[#allocation5 + $0x68] sm:$0xff]   ;;  %p349_p2 = scmp.ne.s32.totalorder %s233_s12, %s348_s13  ;;  %p354_p4 = scmp.lt.s32.totalorder %s348_s13, %s348_s13 }
  0x2a   :  { %v43_v11 = vld [vmem:[#allocation2 + $0x8] sm:$0xff]  ;;  %v297_v13 = vld [vmem:[#allocation5 + $0x28] sm:$0xff]   ;;  %v298_v15 = vld [vmem:[#allocation5 + $0x70] sm:$0xff]  }
  0x2b   :  { %v45_v12 = vmax.f32 %v43_v11, 0.0  ;;  %v299_v16 = vld [vmem:[#allocation5 + $0x30] sm:$0xff]   ;;  %v300_v18 = vld [vmem:[#allocation5 + $0x78] sm:$0xff]   ;;  %p355_p5 = por %p354_p4, %p353_p3 }
  0x2c   :  { %262 = vmatpush3.bf16.msra.mxu0 %v289_v3  ;;  %v42_v17 = vld [vmem:[#allocation2] sm:$0xff]  ;;  %v301_v20 = vld [vmem:[#allocation5 + $0x38] sm:$0xff]  }
  0x2d   :  { %263 = vmatprep.subr.bf16.mxu0 %v290_v4  ;;  %v47_v14 = vpack.c.bf16 %v45_v12, %v45_v12  ;;  %v44_v19 = vmax.f32 %v42_v17, 0.0  ;;  %v242_v23 = vld [vmem:[%s449_s2] ss:$0 sm:$0xff]  ;;  %p356_p6 = pnand %p355_p5, %p349_p2 }
  0x2f   :  { %215 = vmatprep.mubr.bf16.mxu0 %v47_v14  ;;  %v46_v21 = vpack.c.bf16 %v44_v19, %v44_v19 }
  0x30   :  { %264 = vmatpush3.bf16.msra.mxu0 %v291_v5 }
  0x31   :  { %265 = vmatprep.subr.bf16.mxu0 %v292_v6 }
  0x34   :  { %266 = vmatpush3.bf16.msra.mxu0 %v293_v7 }
  0x35   :  { %267 = vmatprep.subr.bf16.mxu0 %v294_v8 }
  0x38   :  { %268 = vmatpush3.bf16.msra.mxu0 %v295_v9 }
  0x39   :  { %269 = vmatprep.subr.bf16.mxu0 %v296_v10 }
  0x3c   :  { %270 = vmatpush3.bf16.msra.mxu0 %v297_v13 }
  0x3d   :  { %271 = vmatprep.subr.bf16.mxu0 %v298_v15 }
  0x40   :  { %272 = vmatpush3.bf16.msra.mxu0 %v299_v16 }
  0x41   :  { %273 = vmatprep.subr.bf16.mxu0 %v300_v18 }
  0x44   :  { %274 = vmatpush3.bf16.msra.mxu0 %v301_v20 }
  0x47   :  { %216 = vmatmul.mubr.bf16.vlgmr.msra.gmra.mrb[0].mxu0 %v46_v21 }
 0x11a   :  { %v275_v22 = vpop.f32.mrb[0].mxu0 }
 0x11b   :  { %v276_v24 = vpop.f32.mrb[1].mxu0 }
 0x11c   :  { %v277_v25 = vadd.f32 %v276_v24, %v275_v22  ;;  %v278_v26 = vpop.f32.mrb[2].mxu0 }
 0x11d   :  { %v279_v27 = vpop.f32.mrb[3].mxu0 }
 0x11e   :  { %v218_v28 = vadd.f32 %v277_v25, %v242_v23 }
 0x120   :  { %302 = vtanh.f32 %v218_v28 }
 0x12a   :  { %v303_v29 = vpop.eup %302 }
 0x12b   :  { %v224_v30 = vpack.c.bf16 %v303_v29, %v303_v29 }
 0x12d   :  { %225 = vst [vmem:[#allocation7] sm:$0xf] %v224_v30 }
 0x12e   :  { %359 = shalt.err (!%p356_p6)
}
 0x12f   :  { %s360_s15 = scalar_lea.hbm %s450_s3, 64 }
 0x130   :  { %p361_p7 = scmp.ne.s32.totalorder %s450_s3, %s360_s15  ;;  %p364_p8 = scmp.lt.u32.totalorder %s360_s15, %s450_s3 }
 0x132   :  { %p366_p9 = pnand %p364_p8, %p361_p7 }
 0x134   :  { %369 = shalt.err (!%p366_p9)
}
 0x135   :  { %235 = dma.vmem_to_hbm [thread:$0]  %s233_s12, 64, %s450_s3, [#allocation4]  }
 0x136   :  { %374 = dma.done.wait [#allocation4], 64  }
 0x137   :  { %375 = vsyncadd [#allocation4], 4294967232 }
 0x138   :  { %239 = vsyncpa [#allocation3], 1 }
 0x139   :  { %240 = vsyncpa [#allocation6], 1 }
 0x13a   :  { %241 = vsyncpa [#allocation4], 1 }

</bundles_post_ra>
